<compile_context>
chip_gen: v7x
topology: tpu7x:2x2x1
jax: 0.10.0
libtpu: 0.0.40
codegen_flags: <defaults>
</compile_context>

<pallas_src>
import functools
import math

import jax
import jax.numpy as jnp
from jax.experimental import pallas as pl
from jax.experimental.pallas import tpu as pltpu


def _dropout_tail_kernel(x_ref, bits_ref, o_ref, *, threshold, scale):
    """One (TB, TF) tile of the tail: fused threshold-compare + scale-select."""
    x = x_ref[...].astype(jnp.float32)
    keep = bits_ref[...] >= jnp.uint32(threshold)          # P(keep) = 1 - p
    o_ref[...] = jnp.where(keep, x * jnp.float32(scale), 0.0).astype(o_ref.dtype)


def _largest_divisor_leq(n, cap):
    cap = min(n, cap)
    for c in range(cap, 0, -1):
        if n % c == 0:
            return c
    return 1


def _pick_col_block(tail, emb, cap=1024):
    # Column block must divide the tail width (grid coverage) and
    # embedding_size (so the tail starts on a block boundary of the full
    # array).  Prefer lane-dense multiples of 128.
    g = math.gcd(tail, emb) if emb > 0 else tail
    top = (min(g, cap) // 128) * 128
    for c in range(top, 0, -128):
        if g % c == 0:
            return c
    return _largest_divisor_leq(g, cap)


def _pick_row_block(b, cap=256):
    if b <= cap:
        return b                          # full extent is always legal
    top = (cap // 8) * 8
    for c in range(top, 0, -8):
        if b % c == 0:
            return c
    return _largest_divisor_leq(b, cap)


def dropout_part(x, key, *, p, embedding_size, training=True):
    """Pallas implementation of DropoutPart.forward.

    x:   [B, F] float array.
    key: jax.random.PRNGKey for the dropout mask (vary it every step).
    """
    if not training or p == 0.0:
        return x                          # nn.Dropout is identity in eval / p == 0
    B, F = x.shape
    tail = F - embedding_size
    if tail <= 0:
        return x
    if p >= 1.0:                          # nn.Dropout(p=1) zeroes the whole slice
        return x.at[:, embedding_size:].set(0)

    # Raw uniform uint32 bits for the tail columns only.
    bits = jax.random.bits(key, (B, tail), dtype=jnp.uint32)
    threshold = min(int(round(p * 2.0 ** 32)), 2 ** 32 - 1)   # drop iff bits < threshold
    scale = 1.0 / (1.0 - p)

    tb = _pick_row_block(B)
    tf = _pick_col_block(tail, embedding_size)
    emb_off = embedding_size // tf        # column offset of the tail, in blocks
    grid = (B // tb, tail // tf)

    kernel = functools.partial(_dropout_tail_kernel, threshold=threshold, scale=scale)

    return pl.pallas_call(
        kernel,
        out_shape=jax.ShapeDtypeStruct((B, F), x.dtype),
        grid=grid,
        in_specs=[
            # Tail blocks of x (the embedding columns are never read).
            pl.BlockSpec((tb, tf), lambda i, j: (i, j + emb_off)),
            # Matching block of random bits (bits array covers the tail only).
            pl.BlockSpec((tb, tf), lambda i, j: (i, j)),
        ],
        # Output is aliased onto x; only tail blocks are written back, so the
        # embedding columns keep their original values (in-place semantics).
        out_specs=pl.BlockSpec((tb, tf), lambda i, j: (i, j + emb_off)),
        input_output_aliases={0: 0},
        compiler_params=pltpu.CompilerParams(
            dimension_semantics=("parallel", "parallel"),
        ),
    )(x, bits)


if __name__ == "__main__":
    # Small shapes consistent with the module: x[:, embedding_size:] must exist.
    B, F = 8, 256
    EMBEDDING_SIZE = 128
    P = 0.5

    root = jax.random.PRNGKey(0)
    kx, kdrop = jax.random.split(root)
    x = jax.random.normal(kx, (B, F), dtype=jnp.float32)

    out = dropout_part(x, kdrop, p=P, embedding_size=EMBEDDING_SIZE, training=True)
    out = jax.block_until_ready(out)

    # --- sanity checks of the semantics ---
    # 1) embedding part untouched
    assert jnp.array_equal(out[:, :EMBEDDING_SIZE], x[:, :EMBEDDING_SIZE])
    # 2) dropout part entries are either 0 or x / (1 - p)
    tail_out = out[:, EMBEDDING_SIZE:]
    tail_in = x[:, EMBEDDING_SIZE:]
    scaled = tail_in / (1.0 - P)
    ok = jnp.logical_or(
        tail_out == 0.0,
        jnp.isclose(tail_out, scaled, rtol=1e-6, atol=1e-6),
    )
    assert bool(jnp.all(ok))
    # 3) roughly half of the tail is dropped (p = 0.5)
    drop_frac = float(jnp.mean((tail_out == 0.0).astype(jnp.float32)))
    assert 0.3 < drop_frac < 0.7
    # 4) eval mode is identity
    ev = dropout_part(x, kdrop, p=P, embedding_size=EMBEDDING_SIZE, training=False)
    assert jnp.array_equal(ev, x)

    print("KERNEL_OK")
</pallas_src>

<mosaic_0001>
module attributes {stable_mosaic.version = 11 : i64} {
  func.func @_dropout_tail_kernel(%arg0: i32, %arg1: i32, %arg2: memref<8x128xf32, #tpu.memory_space<vmem>>, %arg3: memref<8x128xi32, #tpu.memory_space<vmem>>, %arg4: memref<8x128xf32, #tpu.memory_space<vmem>>) attributes {dimension_semantics = [#tpu.dimension_semantics<parallel>, #tpu.dimension_semantics<parallel>], iteration_bounds = array<i64: 1, 1>, scalar_prefetch = 0 : i64, scratch_operands = 0 : i64, tpu.core_type = #tpu.core_type<tc>, window_params = [{transform_indices = @transform_0, window_bounds = array<i64: 8, 128>}, {transform_indices = @transform_1, window_bounds = array<i64: 8, 128>}, {transform_indices = @transform_2, window_bounds = array<i64: 8, 128>}]} {
    %c0 = arith.constant 0 : index
    %c0_0 = arith.constant 0 : index
    %0 = vector.load %arg2[%c0, %c0_0] : memref<8x128xf32, #tpu.memory_space<vmem>>, vector<8x128xf32>
    %c0_1 = arith.constant 0 : index
    %c0_2 = arith.constant 0 : index
    %1 = vector.load %arg3[%c0_1, %c0_2] : memref<8x128xi32, #tpu.memory_space<vmem>>, vector<8x128xi32>
    %c-2147483648_i32 = arith.constant -2147483648 : i32
    %2 = vector.broadcast %c-2147483648_i32 : i32 to vector<8x128xi32>
    %3 = arith.cmpi uge, %1, %2 : vector<8x128xi32>
    %cst = arith.constant 2.000000e+00 : f32
    %4 = vector.broadcast %cst : f32 to vector<8x128xf32>
    %5 = arith.mulf %0, %4 : vector<8x128xf32>
    %cst_3 = arith.constant 0.000000e+00 : f32
    %6 = vector.broadcast %cst_3 : f32 to vector<8x128xf32>
    %7 = arith.select %3, %5, %6 : vector<8x128xi1>, vector<8x128xf32>
    %c0_4 = arith.constant 0 : index
    %c0_5 = arith.constant 0 : index
    %8 = vector.load %arg4[%c0_4, %c0_5] : memref<8x128xf32, #tpu.memory_space<vmem>>, vector<8x128xf32>
    tpu.vector_store %arg4[%c0_4, %c0_5], %7 {strides = array<i32>} : memref<8x128xf32, #tpu.memory_space<vmem>>, vector<8x128xf32>,
    return
  }
  func.func @transform_0(%arg0: i32, %arg1: i32) -> (i32, i32) {
    %c1_i32 = arith.constant 1 : i32
    %0 = arith.addi %arg1, %c1_i32 : i32
    %c0_i32 = arith.constant 0 : i32
    return %arg0, %0 : i32, i32
  }
  func.func @transform_1(%arg0: i32, %arg1: i32) -> (i32, i32) {
    %c0_i32 = arith.constant 0 : i32
    return %arg0, %arg1 : i32, i32
  }
  func.func @transform_2(%arg0: i32, %arg1: i32) -> (i32, i32) {
    %c1_i32 = arith.constant 1 : i32
    %0 = arith.addi %arg1, %c1_i32 : i32
    %c0_i32 = arith.constant 0 : i32
    return %arg0, %0 : i32, i32
  }
}

</mosaic_0001>

<bundles_post_ra>
// kernel: tpu_custom_call.1
= control target key start
LH: loop header
LB: loop body
LE: loop exit
PB: predicated region body
PF: predicated region fallthrough
CT: control target
= control target key end

     0   :  { %7 = vsyncpa [#allocation3], 0  ;;  %s149_s0 = inlined_call_operand.hbm [shape: f32[8,256], index: 0, kind: input, shape index: {}, may-alias: {0,2}]   ;;  %s150_s1 = inlined_call_operand.vmem [shape: u32[8,128], index: 1, kind: input, shape index: {}]   ;;  %s151_s2 = inlined_call_operand.hbm [shape: f32[8,256], index: 2, kind: output, shape index: {}, may-alias: {0,2}]  }
   0x1   :  { %8 = vsyncpa [#allocation4], 0  ;;  %s53_s11 = scalar_lea.hbm %s149_s0, 128  ;;  %s111_s12 = smov [#allocation2]  }
   0x2   :  { %s18_s13 = sshll.u32 %s111_s12, 4  ;;  %s81_s16 = scalar_lea.hbm %s149_s0, 256  ;;  %s19_s13 = int_to_ptr.vmem [resolvable:$true] %s18_s13 }
   0x3   :  { %p58_p0 = scmp.ne.s32.totalorder %s53_s11, %s81_s16  ;;  %p60_p1 = scmp.lt.u32.totalorder %s53_s11, %s149_s0 }
   0x4   :  { %p61_p2 = scmp.lt.u32.totalorder %s81_s16, %s81_s16  ;;  %p63_p4 = scmp.lt.u32.totalorder %s81_s16, %s53_s11 }
   0x6   :  { %p62_p3 = por %p61_p2, %p60_p1 }
   0x8   :  { %p64_p5 = por %p63_p4, %p62_p3 }
   0xa   :  { %p65_p6 = pnand %p64_p5, %p58_p0 }
   0xc   :  { %68 = shalt.err (!%p65_p6)
}
   0xd   :  { %s69_s19 = scalar_lea.vmem %s19_s13, 128  ;;  %p74_p8 = scmp.lt.s32.totalorder %s19_s13, %s19_s13 }
   0xe   :  { %p70_p7 = scmp.ne.s32.totalorder %s19_s13, %s69_s19  ;;  %p75_p9 = scmp.lt.s32.totalorder %s69_s19, %s69_s19 }
  0x10   :  { %p76_p10 = por %p75_p9, %p74_p8 }
  0x12   :  { %p77_p11 = pnand %p76_p10, %p70_p7 }
  0x14   :  { %80 = shalt.err (!%p77_p11)
}
  0x15   :  { %21 = dma.hbm_to_vmem [thread:$0]  %s53_s11, 128, %s19_s13, [#allocation3]  }
  0x16   :  { %107 = dma.done.wait [#allocation3], 128  }
  0x17   :  { %108 = vsyncadd [#allocation3], 4294967168  ;;  %s112_s20 = smov [#allocation5]   ;;  %v29_v0 = vld [vmem:[#allocation2] sm:$0xff]  ;;  %s54_s25 = scalar_lea.hbm %s151_s2, 128 }
  0x18   :  { %s44_s21 = sshll.u32 %s112_s20, 4  ;;  %v30_v1 = vld [vmem:[%s150_s1] sm:$0xff]  ;;  %v32_v2 = vmul.f32 2.0, %v29_v0  ;;  %s45_s21 = int_to_ptr.vmem [resolvable:$true] %s44_s21 }
  0x19   :  { %vm31_vm0 = vcmp.ge.u32.totalorder %v30_v1, 2147483648  ;;  %s82_s26 = scalar_lea.vmem %s45_s21, 128  ;;  %p87_p13 = scmp.lt.s32.totalorder %s45_s21, %s45_s21 }
  0x1a   :  { %v33_v3 = vsel %vm31_vm0, %v32_v2, 0.0  ;;  %p83_p12 = scmp.ne.s32.totalorder %s45_s21, %s82_s26  ;;  %p88_p0 = scmp.lt.s32.totalorder %s82_s26, %s82_s26 }
  0x1b   :  { %34 = vst [vmem:[#allocation5] sm:$0xff] %v33_v3 }
  0x1c   :  { %p89_p1 = por %p88_p0, %p87_p13 }
  0x1e   :  { %p90_p2 = pnand %p89_p1, %p83_p12 }
  0x20   :  { %93 = shalt.err (!%p90_p2)
}
  0x21   :  { %s106_s1 = scalar_lea.hbm %s151_s2, 256  ;;  %p97_p4 = scmp.lt.u32.totalorder %s54_s25, %s151_s2 }
  0x22   :  { %p95_p3 = scmp.ne.s32.totalorder %s54_s25, %s106_s1  ;;  %p98_p5 = scmp.lt.u32.totalorder %s106_s1, %s106_s1 }
  0x23   :  { %p100_p7 = scmp.lt.u32.totalorder %s106_s1, %s54_s25 }
  0x24   :  { %p99_p6 = por %p98_p5, %p97_p4 }
  0x26   :  { %p101_p8 = por %p100_p7, %p99_p6 }
  0x28   :  { %p102_p9 = pnand %p101_p8, %p95_p3 }
  0x2a   :  { %105 = shalt.err (!%p102_p9)
}
  0x2b   :  { %47 = dma.vmem_to_hbm [thread:$0]  %s45_s21, 128, %s54_s25, [#allocation4]  }
  0x2c   :  { %109 = dma.done.wait [#allocation4], 128  }
  0x2d   :  { %110 = vsyncadd [#allocation4], 4294967168 }
  0x2e   :  { %51 = vsyncpa [#allocation3], 1 }
  0x2f   :  { %52 = vsyncpa [#allocation4], 1 }

</bundles_post_ra>
